<compile_context>
chip_gen: v7x
topology: tpu7x:2x2x1
jax: 0.10.0
libtpu: 0.0.40
codegen_flags: <defaults>
</compile_context>

<pallas_src>
import jax
import jax.numpy as jnp
from jax.experimental import pallas as pl
from jax.experimental.pallas import tpu as pltpu

# Problem constants (from the module)
C_IN = 1
C_OUT = 8
K = 3
STRIDE = 1
PADDING = 1
OUTPUT_PADDING = 1
H_IN = W_IN = 10
H_OUT = (H_IN - 1) * STRIDE - 2 * PADDING + K + OUTPUT_PADDING  # 11
W_OUT = (W_IN - 1) * STRIDE - 2 * PADDING + K + OUTPUT_PADDING  # 11
PAD_LO = K - 1 - PADDING                    # 1  (top/left)
PAD_HI = K - 1 - PADDING + OUTPUT_PADDING   # 2  (bottom/right)
H_PAD = H_IN + PAD_LO + PAD_HI              # 13
W_PAD = W_IN + PAD_LO + PAD_HI              # 13


def convt_kernel(x_ref, w_ref, b_ref, o_ref):
    """x_ref: (H_IN, W_IN)          f32  raw input plane
       w_ref: (C_OUT, K*K)          f32  un-flipped weight, w[oc, ki*K + kj]
       b_ref: (C_OUT, 1)            f32  bias
       o_ref: (C_OUT, H_OUT*W_OUT)  f32  lane-dense output slab
    """
    x = x_ref[...]                                   # (10, 10)
    w = w_ref[...]                                   # (8, 9)
    b = b_ref[...]                                   # (8, 1)

    # Column-only zero padding as a register value (no VMEM scratch round trip).
    # Row padding is handled by skipping the all-zero padded rows at trace time below.
    zl = jnp.zeros((H_IN, PAD_LO), jnp.float32)
    zr = jnp.zeros((H_IN, PAD_HI), jnp.float32)
    xc = jnp.concatenate([zl, x, zr], axis=1)        # (10, 13)

    # Hoisted kj lane-shifts of the (column-)padded image, each (10, 11).
    xs = [xc[:, kj:kj + W_OUT] for kj in range(K)]

    # Dedup of row sublane-broadcasts: one (8, 11) broadcast per (kj, real row) = 30 total.
    xrow_b = [[jnp.broadcast_to(xs[kj][r:r + 1, :], (C_OUT, W_OUT)) for r in range(H_IN)]
              for kj in range(K)]

    # Per-tap flipped-weight lane-broadcasts, hoisted out of the row loop (9 total).
    # Spatial flip is a trace-time index permutation (free).
    wb = [[jnp.broadcast_to(
               w[:, (K - 1 - ki) * K + (K - 1 - kj):(K - 1 - ki) * K + (K - 1 - kj) + 1],
               (C_OUT, W_OUT))
           for kj in range(K)] for ki in range(K)]

    bias_b = jnp.broadcast_to(b, (C_OUT, W_OUT))     # (8, 11), hoisted

    # Fully unrolled VPU MAC; taps hitting the zero-padded rows are skipped at trace time.
    rows = []
    for i in range(H_OUT):
        row_acc = bias_b
        for ki in range(K):
            r = i + ki - PAD_LO                      # index into the real image rows
            if 0 <= r < H_IN:
                for kj in range(K):
                    row_acc = row_acc + wb[ki][kj] * xrow_b[kj][r]
        rows.append(row_acc)

    # Single lane-dense (8, 121) store instead of 11 masked partial stores.
    o_ref[...] = jnp.concatenate(rows, axis=1)


def conv_transpose2d(x_nchw, weight, bias):
    """x_nchw: (1, 1, H_IN, W_IN); weight: (C_IN, C_OUT, K, K); bias: (C_OUT,).
    Returns (1, C_OUT, H_OUT, W_OUT)."""
    assert x_nchw.shape == (1, C_IN, H_IN, W_IN)
    # Only free reshapes in the wrapper; pad / flip / broadcast all happen in-kernel.
    x2d = x_nchw.reshape(H_IN, W_IN).astype(jnp.float32)
    w9 = weight.reshape(C_OUT, K * K).astype(jnp.float32)   # (1,8,3,3) -> (8,9), c_in == 1
    b2 = bias.reshape(C_OUT, 1).astype(jnp.float32)

    out = pl.pallas_call(
        convt_kernel,
        out_shape=jax.ShapeDtypeStruct((C_OUT, H_OUT * W_OUT), jnp.float32),
        in_specs=[
            pl.BlockSpec(memory_space=pltpu.MemorySpace.VMEM),
            pl.BlockSpec(memory_space=pltpu.MemorySpace.VMEM),
            pl.BlockSpec(memory_space=pltpu.MemorySpace.VMEM),
        ],
        out_specs=pl.BlockSpec(memory_space=pltpu.MemorySpace.VMEM),
    )(x2d, w9, b2)
    return out.reshape(1, C_OUT, H_OUT, W_OUT)


def reference(x_nchw, weight, bias):
    """Pure-JAX reference of the same math for a sanity check."""
    x2d = x_nchw[0, 0]
    xpad = jnp.pad(x2d, ((PAD_LO, PAD_HI), (PAD_LO, PAD_HI)))
    wflip = weight[0, :, ::-1, ::-1]
    out = jnp.zeros((C_OUT, H_OUT, W_OUT), jnp.float32)
    for ki in range(K):
        for kj in range(K):
            out = out + wflip[:, ki, kj][:, None, None] \
                * xpad[ki:ki + H_OUT, kj:kj + W_OUT][None]
    return (out + bias[:, None, None])[None]


if __name__ == "__main__":
    key = jax.random.PRNGKey(0)
    kx, kw, kb = jax.random.split(key, 3)

    # Deterministic input and parameters (PyTorch weight convention: (C_in, C_out, K, K)).
    x = jax.random.normal(kx, (1, C_IN, H_IN, W_IN), dtype=jnp.float32)
    fan_in = C_OUT * K * K
    bound = 1.0 / (fan_in ** 0.5)
    weight = jax.random.uniform(kw, (C_IN, C_OUT, K, K), jnp.float32, -bound, bound)
    bias = jax.random.uniform(kb, (C_OUT,), jnp.float32, -bound, bound)

    out = conv_transpose2d(x, weight, bias)
    jax.block_until_ready(out)

    ref = reference(x, weight, bias)
    assert out.shape == (1, C_OUT, H_OUT, W_OUT), out.shape
    assert jnp.allclose(out, ref, atol=1e-5, rtol=1e-5), "mismatch vs reference"

    print("KERNEL_OK")
</pallas_src>

<mosaic_0001>
module attributes {stable_mosaic.version = 11 : i64} {
  func.func @convt_kernel(%arg0: memref<10x10xf32, #tpu.memory_space<vmem>>, %arg1: memref<8x9xf32, #tpu.memory_space<vmem>>, %arg2: memref<8x1xf32, #tpu.memory_space<vmem>>, %arg3: memref<8x121xf32, #tpu.memory_space<vmem>>) attributes {dimension_semantics = [], scalar_prefetch = 0 : i64, scratch_operands = 0 : i64, tpu.core_type = #tpu.core_type<tc>} {
    %c0 = arith.constant 0 : index
    %c0_0 = arith.constant 0 : index
    %0 = vector.load %arg0[%c0, %c0_0] : memref<10x10xf32, #tpu.memory_space<vmem>>, vector<10x10xf32>
    %c0_1 = arith.constant 0 : index
    %c0_2 = arith.constant 0 : index
    %1 = vector.load %arg1[%c0_1, %c0_2] : memref<8x9xf32, #tpu.memory_space<vmem>>, vector<8x9xf32>
    %c0_3 = arith.constant 0 : index
    %c0_4 = arith.constant 0 : index
    %2 = vector.load %arg2[%c0_3, %c0_4] : memref<8x1xf32, #tpu.memory_space<vmem>>, vector<8x1xf32>
    %cst = arith.constant 0.000000e+00 : f32
    %3 = vector.broadcast %cst : f32 to vector<10x1xf32>
    %cst_5 = arith.constant 0.000000e+00 : f32
    %4 = vector.broadcast %cst_5 : f32 to vector<10x2xf32>
    %5 = tpu.concatenate %3, %0, %4 in 1 : vector<10x1xf32>, vector<10x10xf32>, vector<10x2xf32> -> vector<10x13xf32>
    %6 = vector.extract_strided_slice %5 {offsets = [0, 0], sizes = [10, 11], strides = [1, 1]} : vector<10x13xf32> to vector<10x11xf32>
    %7 = vector.extract_strided_slice %5 {offsets = [0, 1], sizes = [10, 11], strides = [1, 1]} : vector<10x13xf32> to vector<10x11xf32>
    %8 = vector.extract_strided_slice %5 {offsets = [0, 2], sizes = [10, 11], strides = [1, 1]} : vector<10x13xf32> to vector<10x11xf32>
    %9 = vector.extract_strided_slice %6 {offsets = [0, 0], sizes = [1, 11], strides = [1, 1]} : vector<10x11xf32> to vector<1x11xf32>
    %10 = vector.shape_cast %9 : vector<1x11xf32> to vector<1x11xf32>
    %11 = vector.broadcast %10 : vector<1x11xf32> to vector<8x11xf32>
    %12 = vector.extract_strided_slice %6 {offsets = [1, 0], sizes = [1, 11], strides = [1, 1]} : vector<10x11xf32> to vector<1x11xf32>
    %13 = vector.shape_cast %12 : vector<1x11xf32> to vector<1x11xf32>
    %14 = vector.broadcast %13 : vector<1x11xf32> to vector<8x11xf32>
    %15 = vector.extract_strided_slice %6 {offsets = [2, 0], sizes = [1, 11], strides = [1, 1]} : vector<10x11xf32> to vector<1x11xf32>
    %16 = vector.shape_cast %15 : vector<1x11xf32> to vector<1x11xf32>
    %17 = vector.broadcast %16 : vector<1x11xf32> to vector<8x11xf32>
    %18 = vector.extract_strided_slice %6 {offsets = [3, 0], sizes = [1, 11], strides = [1, 1]} : vector<10x11xf32> to vector<1x11xf32>
    %19 = vector.shape_cast %18 : vector<1x11xf32> to vector<1x11xf32>
    %20 = vector.broadcast %19 : vector<1x11xf32> to vector<8x11xf32>
    %21 = vector.extract_strided_slice %6 {offsets = [4, 0], sizes = [1, 11], strides = [1, 1]} : vector<10x11xf32> to vector<1x11xf32>
    %22 = vector.shape_cast %21 : vector<1x11xf32> to vector<1x11xf32>
    %23 = vector.broadcast %22 : vector<1x11xf32> to vector<8x11xf32>
    %24 = vector.extract_strided_slice %6 {offsets = [5, 0], sizes = [1, 11], strides = [1, 1]} : vector<10x11xf32> to vector<1x11xf32>
    %25 = vector.shape_cast %24 : vector<1x11xf32> to vector<1x11xf32>
    %26 = vector.broadcast %25 : vector<1x11xf32> to vector<8x11xf32>
    %27 = vector.extract_strided_slice %6 {offsets = [6, 0], sizes = [1, 11], strides = [1, 1]} : vector<10x11xf32> to vector<1x11xf32>
    %28 = vector.shape_cast %27 : vector<1x11xf32> to vector<1x11xf32>
    %29 = vector.broadcast %28 : vector<1x11xf32> to vector<8x11xf32>
    %30 = vector.extract_strided_slice %6 {offsets = [7, 0], sizes = [1, 11], strides = [1, 1]} : vector<10x11xf32> to vector<1x11xf32>
    %31 = vector.shape_cast %30 : vector<1x11xf32> to vector<1x11xf32>
    %32 = vector.broadcast %31 : vector<1x11xf32> to vector<8x11xf32>
    %33 = vector.extract_strided_slice %6 {offsets = [8, 0], sizes = [1, 11], strides = [1, 1]} : vector<10x11xf32> to vector<1x11xf32>
    %34 = vector.shape_cast %33 : vector<1x11xf32> to vector<1x11xf32>
    %35 = vector.broadcast %34 : vector<1x11xf32> to vector<8x11xf32>
    %36 = vector.extract_strided_slice %6 {offsets = [9, 0], sizes = [1, 11], strides = [1, 1]} : vector<10x11xf32> to vector<1x11xf32>
    %37 = vector.shape_cast %36 : vector<1x11xf32> to vector<1x11xf32>
    %38 = vector.broadcast %37 : vector<1x11xf32> to vector<8x11xf32>
    %39 = vector.extract_strided_slice %7 {offsets = [0, 0], sizes = [1, 11], strides = [1, 1]} : vector<10x11xf32> to vector<1x11xf32>
    %40 = vector.shape_cast %39 : vector<1x11xf32> to vector<1x11xf32>
    %41 = vector.broadcast %40 : vector<1x11xf32> to vector<8x11xf32>
    %42 = vector.extract_strided_slice %7 {offsets = [1, 0], sizes = [1, 11], strides = [1, 1]} : vector<10x11xf32> to vector<1x11xf32>
    %43 = vector.shape_cast %42 : vector<1x11xf32> to vector<1x11xf32>
    %44 = vector.broadcast %43 : vector<1x11xf32> to vector<8x11xf32>
    %45 = vector.extract_strided_slice %7 {offsets = [2, 0], sizes = [1, 11], strides = [1, 1]} : vector<10x11xf32> to vector<1x11xf32>
    %46 = vector.shape_cast %45 : vector<1x11xf32> to vector<1x11xf32>
    %47 = vector.broadcast %46 : vector<1x11xf32> to vector<8x11xf32>
    %48 = vector.extract_strided_slice %7 {offsets = [3, 0], sizes = [1, 11], strides = [1, 1]} : vector<10x11xf32> to vector<1x11xf32>
    %49 = vector.shape_cast %48 : vector<1x11xf32> to vector<1x11xf32>
    %50 = vector.broadcast %49 : vector<1x11xf32> to vector<8x11xf32>
    %51 = vector.extract_strided_slice %7 {offsets = [4, 0], sizes = [1, 11], strides = [1, 1]} : vector<10x11xf32> to vector<1x11xf32>
    %52 = vector.shape_cast %51 : vector<1x11xf32> to vector<1x11xf32>
    %53 = vector.broadcast %52 : vector<1x11xf32> to vector<8x11xf32>
    %54 = vector.extract_strided_slice %7 {offsets = [5, 0], sizes = [1, 11], strides = [1, 1]} : vector<10x11xf32> to vector<1x11xf32>
    %55 = vector.shape_cast %54 : vector<1x11xf32> to vector<1x11xf32>
    %56 = vector.broadcast %55 : vector<1x11xf32> to vector<8x11xf32>
    %57 = vector.extract_strided_slice %7 {offsets = [6, 0], sizes = [1, 11], strides = [1, 1]} : vector<10x11xf32> to vector<1x11xf32>
    %58 = vector.shape_cast %57 : vector<1x11xf32> to vector<1x11xf32>
    %59 = vector.broadcast %58 : vector<1x11xf32> to vector<8x11xf32>
    %60 = vector.extract_strided_slice %7 {offsets = [7, 0], sizes = [1, 11], strides = [1, 1]} : vector<10x11xf32> to vector<1x11xf32>
    %61 = vector.shape_cast %60 : vector<1x11xf32> to vector<1x11xf32>
    %62 = vector.broadcast %61 : vector<1x11xf32> to vector<8x11xf32>
    %63 = vector.extract_strided_slice %7 {offsets = [8, 0], sizes = [1, 11], strides = [1, 1]} : vector<10x11xf32> to vector<1x11xf32>
    %64 = vector.shape_cast %63 : vector<1x11xf32> to vector<1x11xf32>
    %65 = vector.broadcast %64 : vector<1x11xf32> to vector<8x11xf32>
    %66 = vector.extract_strided_slice %7 {offsets = [9, 0], sizes = [1, 11], strides = [1, 1]} : vector<10x11xf32> to vector<1x11xf32>
    %67 = vector.shape_cast %66 : vector<1x11xf32> to vector<1x11xf32>
    %68 = vector.broadcast %67 : vector<1x11xf32> to vector<8x11xf32>
    %69 = vector.extract_strided_slice %8 {offsets = [0, 0], sizes = [1, 11], strides = [1, 1]} : vector<10x11xf32> to vector<1x11xf32>
    %70 = vector.shape_cast %69 : vector<1x11xf32> to vector<1x11xf32>
    %71 = vector.broadcast %70 : vector<1x11xf32> to vector<8x11xf32>
    %72 = vector.extract_strided_slice %8 {offsets = [1, 0], sizes = [1, 11], strides = [1, 1]} : vector<10x11xf32> to vector<1x11xf32>
    %73 = vector.shape_cast %72 : vector<1x11xf32> to vector<1x11xf32>
    %74 = vector.broadcast %73 : vector<1x11xf32> to vector<8x11xf32>
    %75 = vector.extract_strided_slice %8 {offsets = [2, 0], sizes = [1, 11], strides = [1, 1]} : vector<10x11xf32> to vector<1x11xf32>
    %76 = vector.shape_cast %75 : vector<1x11xf32> to vector<1x11xf32>
    %77 = vector.broadcast %76 : vector<1x11xf32> to vector<8x11xf32>
    %78 = vector.extract_strided_slice %8 {offsets = [3, 0], sizes = [1, 11], strides = [1, 1]} : vector<10x11xf32> to vector<1x11xf32>
    %79 = vector.shape_cast %78 : vector<1x11xf32> to vector<1x11xf32>
    %80 = vector.broadcast %79 : vector<1x11xf32> to vector<8x11xf32>
    %81 = vector.extract_strided_slice %8 {offsets = [4, 0], sizes = [1, 11], strides = [1, 1]} : vector<10x11xf32> to vector<1x11xf32>
    %82 = vector.shape_cast %81 : vector<1x11xf32> to vector<1x11xf32>
    %83 = vector.broadcast %82 : vector<1x11xf32> to vector<8x11xf32>
    %84 = vector.extract_strided_slice %8 {offsets = [5, 0], sizes = [1, 11], strides = [1, 1]} : vector<10x11xf32> to vector<1x11xf32>
    %85 = vector.shape_cast %84 : vector<1x11xf32> to vector<1x11xf32>
    %86 = vector.broadcast %85 : vector<1x11xf32> to vector<8x11xf32>
    %87 = vector.extract_strided_slice %8 {offsets = [6, 0], sizes = [1, 11], strides = [1, 1]} : vector<10x11xf32> to vector<1x11xf32>
    %88 = vector.shape_cast %87 : vector<1x11xf32> to vector<1x11xf32>
    %89 = vector.broadcast %88 : vector<1x11xf32> to vector<8x11xf32>
    %90 = vector.extract_strided_slice %8 {offsets = [7, 0], sizes = [1, 11], strides = [1, 1]} : vector<10x11xf32> to vector<1x11xf32>
    %91 = vector.shape_cast %90 : vector<1x11xf32> to vector<1x11xf32>
    %92 = vector.broadcast %91 : vector<1x11xf32> to vector<8x11xf32>
    %93 = vector.extract_strided_slice %8 {offsets = [8, 0], sizes = [1, 11], strides = [1, 1]} : vector<10x11xf32> to vector<1x11xf32>
    %94 = vector.shape_cast %93 : vector<1x11xf32> to vector<1x11xf32>
    %95 = vector.broadcast %94 : vector<1x11xf32> to vector<8x11xf32>
    %96 = vector.extract_strided_slice %8 {offsets = [9, 0], sizes = [1, 11], strides = [1, 1]} : vector<10x11xf32> to vector<1x11xf32>
    %97 = vector.shape_cast %96 : vector<1x11xf32> to vector<1x11xf32>
    %98 = vector.broadcast %97 : vector<1x11xf32> to vector<8x11xf32>
    %99 = vector.extract_strided_slice %1 {offsets = [0, 8], sizes = [8, 1], strides = [1, 1]} : vector<8x9xf32> to vector<8x1xf32>
    %100 = vector.shape_cast %99 : vector<8x1xf32> to vector<8x1xf32>
    %101 = vector.broadcast %100 : vector<8x1xf32> to vector<8x11xf32>
    %102 = vector.extract_strided_slice %1 {offsets = [0, 7], sizes = [8, 1], strides = [1, 1]} : vector<8x9xf32> to vector<8x1xf32>
    %103 = vector.shape_cast %102 : vector<8x1xf32> to vector<8x1xf32>
    %104 = vector.broadcast %103 : vector<8x1xf32> to vector<8x11xf32>
    %105 = vector.extract_strided_slice %1 {offsets = [0, 6], sizes = [8, 1], strides = [1, 1]} : vector<8x9xf32> to vector<8x1xf32>
    %106 = vector.shape_cast %105 : vector<8x1xf32> to vector<8x1xf32>
    %107 = vector.broadcast %106 : vector<8x1xf32> to vector<8x11xf32>
    %108 = vector.extract_strided_slice %1 {offsets = [0, 5], sizes = [8, 1], strides = [1, 1]} : vector<8x9xf32> to vector<8x1xf32>
    %109 = vector.shape_cast %108 : vector<8x1xf32> to vector<8x1xf32>
    %110 = vector.broadcast %109 : vector<8x1xf32> to vector<8x11xf32>
    %111 = vector.extract_strided_slice %1 {offsets = [0, 4], sizes = [8, 1], strides = [1, 1]} : vector<8x9xf32> to vector<8x1xf32>
    %112 = vector.shape_cast %111 : vector<8x1xf32> to vector<8x1xf32>
    %113 = vector.broadcast %112 : vector<8x1xf32> to vector<8x11xf32>
    %114 = vector.extract_strided_slice %1 {offsets = [0, 3], sizes = [8, 1], strides = [1, 1]} : vector<8x9xf32> to vector<8x1xf32>
    %115 = vector.shape_cast %114 : vector<8x1xf32> to vector<8x1xf32>
    %116 = vector.broadcast %115 : vector<8x1xf32> to vector<8x11xf32>
    %117 = vector.extract_strided_slice %1 {offsets = [0, 2], sizes = [8, 1], strides = [1, 1]} : vector<8x9xf32> to vector<8x1xf32>
    %118 = vector.shape_cast %117 : vector<8x1xf32> to vector<8x1xf32>
    %119 = vector.broadcast %118 : vector<8x1xf32> to vector<8x11xf32>
    %120 = vector.extract_strided_slice %1 {offsets = [0, 1], sizes = [8, 1], strides = [1, 1]} : vector<8x9xf32> to vector<8x1xf32>
    %121 = vector.shape_cast %120 : vector<8x1xf32> to vector<8x1xf32>
    %122 = vector.broadcast %121 : vector<8x1xf32> to vector<8x11xf32>
    %123 = vector.extract_strided_slice %1 {offsets = [0, 0], sizes = [8, 1], strides = [1, 1]} : vector<8x9xf32> to vector<8x1xf32>
    %124 = vector.shape_cast %123 : vector<8x1xf32> to vector<8x1xf32>
    %125 = vector.broadcast %124 : vector<8x1xf32> to vector<8x11xf32>
    %126 = vector.shape_cast %2 : vector<8x1xf32> to vector<8x1xf32>
    %127 = vector.broadcast %126 : vector<8x1xf32> to vector<8x11xf32>
    %128 = arith.mulf %110, %11 : vector<8x11xf32>
    %129 = arith.addf %127, %128 : vector<8x11xf32>
    %130 = arith.mulf %113, %41 : vector<8x11xf32>
    %131 = arith.addf %129, %130 : vector<8x11xf32>
    %132 = arith.mulf %116, %71 : vector<8x11xf32>
    %133 = arith.addf %131, %132 : vector<8x11xf32>
    %134 = arith.mulf %119, %14 : vector<8x11xf32>
    %135 = arith.addf %133, %134 : vector<8x11xf32>
    %136 = arith.mulf %122, %44 : vector<8x11xf32>
    %137 = arith.addf %135, %136 : vector<8x11xf32>
    %138 = arith.mulf %125, %74 : vector<8x11xf32>
    %139 = arith.addf %137, %138 : vector<8x11xf32>
    %140 = arith.mulf %101, %11 : vector<8x11xf32>
    %141 = arith.addf %127, %140 : vector<8x11xf32>
    %142 = arith.mulf %104, %41 : vector<8x11xf32>
    %143 = arith.addf %141, %142 : vector<8x11xf32>
    %144 = arith.mulf %107, %71 : vector<8x11xf32>
    %145 = arith.addf %143, %144 : vector<8x11xf32>
    %146 = arith.mulf %110, %14 : vector<8x11xf32>
    %147 = arith.addf %145, %146 : vector<8x11xf32>
    %148 = arith.mulf %113, %44 : vector<8x11xf32>
    %149 = arith.addf %147, %148 : vector<8x11xf32>
    %150 = arith.mulf %116, %74 : vector<8x11xf32>
    %151 = arith.addf %149, %150 : vector<8x11xf32>
    %152 = arith.mulf %119, %17 : vector<8x11xf32>
    %153 = arith.addf %151, %152 : vector<8x11xf32>
    %154 = arith.mulf %122, %47 : vector<8x11xf32>
    %155 = arith.addf %153, %154 : vector<8x11xf32>
    %156 = arith.mulf %125, %77 : vector<8x11xf32>
    %157 = arith.addf %155, %156 : vector<8x11xf32>
    %158 = arith.mulf %101, %14 : vector<8x11xf32>
    %159 = arith.addf %127, %158 : vector<8x11xf32>
    %160 = arith.mulf %104, %44 : vector<8x11xf32>
    %161 = arith.addf %159, %160 : vector<8x11xf32>
    %162 = arith.mulf %107, %74 : vector<8x11xf32>
    %163 = arith.addf %161, %162 : vector<8x11xf32>
    %164 = arith.mulf %110, %17 : vector<8x11xf32>
    %165 = arith.addf %163, %164 : vector<8x11xf32>
    %166 = arith.mulf %113, %47 : vector<8x11xf32>
    %167 = arith.addf %165, %166 : vector<8x11xf32>
    %168 = arith.mulf %116, %77 : vector<8x11xf32>
    %169 = arith.addf %167, %168 : vector<8x11xf32>
    %170 = arith.mulf %119, %20 : vector<8x11xf32>
    %171 = arith.addf %169, %170 : vector<8x11xf32>
    %172 = arith.mulf %122, %50 : vector<8x11xf32>
    %173 = arith.addf %171, %172 : vector<8x11xf32>
    %174 = arith.mulf %125, %80 : vector<8x11xf32>
    %175 = arith.addf %173, %174 : vector<8x11xf32>
    %176 = arith.mulf %101, %17 : vector<8x11xf32>
    %177 = arith.addf %127, %176 : vector<8x11xf32>
    %178 = arith.mulf %104, %47 : vector<8x11xf32>
    %179 = arith.addf %177, %178 : vector<8x11xf32>
    %180 = arith.mulf %107, %77 : vector<8x11xf32>
    %181 = arith.addf %179, %180 : vector<8x11xf32>
    %182 = arith.mulf %110, %20 : vector<8x11xf32>
    %183 = arith.addf %181, %182 : vector<8x11xf32>
    %184 = arith.mulf %113, %50 : vector<8x11xf32>
    %185 = arith.addf %183, %184 : vector<8x11xf32>
    %186 = arith.mulf %116, %80 : vector<8x11xf32>
    %187 = arith.addf %185, %186 : vector<8x11xf32>
    %188 = arith.mulf %119, %23 : vector<8x11xf32>
    %189 = arith.addf %187, %188 : vector<8x11xf32>
    %190 = arith.mulf %122, %53 : vector<8x11xf32>
    %191 = arith.addf %189, %190 : vector<8x11xf32>
    %192 = arith.mulf %125, %83 : vector<8x11xf32>
    %193 = arith.addf %191, %192 : vector<8x11xf32>
    %194 = arith.mulf %101, %20 : vector<8x11xf32>
    %195 = arith.addf %127, %194 : vector<8x11xf32>
    %196 = arith.mulf %104, %50 : vector<8x11xf32>
    %197 = arith.addf %195, %196 : vector<8x11xf32>
    %198 = arith.mulf %107, %80 : vector<8x11xf32>
    %199 = arith.addf %197, %198 : vector<8x11xf32>
    %200 = arith.mulf %110, %23 : vector<8x11xf32>
    %201 = arith.addf %199, %200 : vector<8x11xf32>
    %202 = arith.mulf %113, %53 : vector<8x11xf32>
    %203 = arith.addf %201, %202 : vector<8x11xf32>
    %204 = arith.mulf %116, %83 : vector<8x11xf32>
    %205 = arith.addf %203, %204 : vector<8x11xf32>
    %206 = arith.mulf %119, %26 : vector<8x11xf32>
    %207 = arith.addf %205, %206 : vector<8x11xf32>
    %208 = arith.mulf %122, %56 : vector<8x11xf32>
    %209 = arith.addf %207, %208 : vector<8x11xf32>
    %210 = arith.mulf %125, %86 : vector<8x11xf32>
    %211 = arith.addf %209, %210 : vector<8x11xf32>
    %212 = arith.mulf %101, %23 : vector<8x11xf32>
    %213 = arith.addf %127, %212 : vector<8x11xf32>
    %214 = arith.mulf %104, %53 : vector<8x11xf32>
    %215 = arith.addf %213, %214 : vector<8x11xf32>
    %216 = arith.mulf %107, %83 : vector<8x11xf32>
    %217 = arith.addf %215, %216 : vector<8x11xf32>
    %218 = arith.mulf %110, %26 : vector<8x11xf32>
    %219 = arith.addf %217, %218 : vector<8x11xf32>
    %220 = arith.mulf %113, %56 : vector<8x11xf32>
    %221 = arith.addf %219, %220 : vector<8x11xf32>
    %222 = arith.mulf %116, %86 : vector<8x11xf32>
    %223 = arith.addf %221, %222 : vector<8x11xf32>
    %224 = arith.mulf %119, %29 : vector<8x11xf32>
    %225 = arith.addf %223, %224 : vector<8x11xf32>
    %226 = arith.mulf %122, %59 : vector<8x11xf32>
    %227 = arith.addf %225, %226 : vector<8x11xf32>
    %228 = arith.mulf %125, %89 : vector<8x11xf32>
    %229 = arith.addf %227, %228 : vector<8x11xf32>
    %230 = arith.mulf %101, %26 : vector<8x11xf32>
    %231 = arith.addf %127, %230 : vector<8x11xf32>
    %232 = arith.mulf %104, %56 : vector<8x11xf32>
    %233 = arith.addf %231, %232 : vector<8x11xf32>
    %234 = arith.mulf %107, %86 : vector<8x11xf32>
    %235 = arith.addf %233, %234 : vector<8x11xf32>
    %236 = arith.mulf %110, %29 : vector<8x11xf32>
    %237 = arith.addf %235, %236 : vector<8x11xf32>
    %238 = arith.mulf %113, %59 : vector<8x11xf32>
    %239 = arith.addf %237, %238 : vector<8x11xf32>
    %240 = arith.mulf %116, %89 : vector<8x11xf32>
    %241 = arith.addf %239, %240 : vector<8x11xf32>
    %242 = arith.mulf %119, %32 : vector<8x11xf32>
    %243 = arith.addf %241, %242 : vector<8x11xf32>
    %244 = arith.mulf %122, %62 : vector<8x11xf32>
    %245 = arith.addf %243, %244 : vector<8x11xf32>
    %246 = arith.mulf %125, %92 : vector<8x11xf32>
    %247 = arith.addf %245, %246 : vector<8x11xf32>
    %248 = arith.mulf %101, %29 : vector<8x11xf32>
    %249 = arith.addf %127, %248 : vector<8x11xf32>
    %250 = arith.mulf %104, %59 : vector<8x11xf32>
    %251 = arith.addf %249, %250 : vector<8x11xf32>
    %252 = arith.mulf %107, %89 : vector<8x11xf32>
    %253 = arith.addf %251, %252 : vector<8x11xf32>
    %254 = arith.mulf %110, %32 : vector<8x11xf32>
    %255 = arith.addf %253, %254 : vector<8x11xf32>
    %256 = arith.mulf %113, %62 : vector<8x11xf32>
    %257 = arith.addf %255, %256 : vector<8x11xf32>
    %258 = arith.mulf %116, %92 : vector<8x11xf32>
    %259 = arith.addf %257, %258 : vector<8x11xf32>
    %260 = arith.mulf %119, %35 : vector<8x11xf32>
    %261 = arith.addf %259, %260 : vector<8x11xf32>
    %262 = arith.mulf %122, %65 : vector<8x11xf32>
    %263 = arith.addf %261, %262 : vector<8x11xf32>
    %264 = arith.mulf %125, %95 : vector<8x11xf32>
    %265 = arith.addf %263, %264 : vector<8x11xf32>
    %266 = arith.mulf %101, %32 : vector<8x11xf32>
    %267 = arith.addf %127, %266 : vector<8x11xf32>
    %268 = arith.mulf %104, %62 : vector<8x11xf32>
    %269 = arith.addf %267, %268 : vector<8x11xf32>
    %270 = arith.mulf %107, %92 : vector<8x11xf32>
    %271 = arith.addf %269, %270 : vector<8x11xf32>
    %272 = arith.mulf %110, %35 : vector<8x11xf32>
    %273 = arith.addf %271, %272 : vector<8x11xf32>
    %274 = arith.mulf %113, %65 : vector<8x11xf32>
    %275 = arith.addf %273, %274 : vector<8x11xf32>
    %276 = arith.mulf %116, %95 : vector<8x11xf32>
    %277 = arith.addf %275, %276 : vector<8x11xf32>
    %278 = arith.mulf %119, %38 : vector<8x11xf32>
    %279 = arith.addf %277, %278 : vector<8x11xf32>
    %280 = arith.mulf %122, %68 : vector<8x11xf32>
    %281 = arith.addf %279, %280 : vector<8x11xf32>
    %282 = arith.mulf %125, %98 : vector<8x11xf32>
    %283 = arith.addf %281, %282 : vector<8x11xf32>
    %284 = arith.mulf %101, %35 : vector<8x11xf32>
    %285 = arith.addf %127, %284 : vector<8x11xf32>
    %286 = arith.mulf %104, %65 : vector<8x11xf32>
    %287 = arith.addf %285, %286 : vector<8x11xf32>
    %288 = arith.mulf %107, %95 : vector<8x11xf32>
    %289 = arith.addf %287, %288 : vector<8x11xf32>
    %290 = arith.mulf %110, %38 : vector<8x11xf32>
    %291 = arith.addf %289, %290 : vector<8x11xf32>
    %292 = arith.mulf %113, %68 : vector<8x11xf32>
    %293 = arith.addf %291, %292 : vector<8x11xf32>
    %294 = arith.mulf %116, %98 : vector<8x11xf32>
    %295 = arith.addf %293, %294 : vector<8x11xf32>
    %296 = arith.mulf %101, %38 : vector<8x11xf32>
    %297 = arith.addf %127, %296 : vector<8x11xf32>
    %298 = arith.mulf %104, %68 : vector<8x11xf32>
    %299 = arith.addf %297, %298 : vector<8x11xf32>
    %300 = arith.mulf %107, %98 : vector<8x11xf32>
    %301 = arith.addf %299, %300 : vector<8x11xf32>
    %302 = tpu.concatenate %139, %157, %175, %193, %211, %229, %247, %265, %283, %295, %301 in 1 : vector<8x11xf32>, vector<8x11xf32>, vector<8x11xf32>, vector<8x11xf32>, vector<8x11xf32>, vector<8x11xf32>, vector<8x11xf32>, vector<8x11xf32>, vector<8x11xf32>, vector<8x11xf32>, vector<8x11xf32> -> vector<8x121xf32>
    %c0_6 = arith.constant 0 : index
    %c0_7 = arith.constant 0 : index
    %303 = vector.load %arg3[%c0_6, %c0_7] : memref<8x121xf32, #tpu.memory_space<vmem>>, vector<8x121xf32>
    tpu.vector_store %arg3[%c0_6, %c0_7], %302 {strides = array<i32>} : memref<8x121xf32, #tpu.memory_space<vmem>>, vector<8x121xf32>,
    return
  }
}

</mosaic_0001>

<bundles_post_ra>
// kernel: tpu_custom_call.1
= control target key start
LH: loop header
LB: loop body
LE: loop exit
PB: predicated region body
PF: predicated region fallthrough
CT: control target
= control target key end

     0   :  { %8 = vsyncpa [#allocation3], 0  ;;  %s1137_s0 = inlined_call_operand.hbm [shape: f32[10,10], index: 0, kind: input, shape index: {}]   ;;  %s1138_s1 = inlined_call_operand.vmem [shape: f32[8,9], index: 1, kind: input, shape index: {}]   ;;  %s1139_s2 = inlined_call_operand.vmem [shape: f32[8,1], index: 2, kind: input, shape index: {}]   ;;  %s1140_s3 = inlined_call_operand.hbm [shape: f32[8,121], index: 3, kind: output, shape index: {}]  }
   0x1   :  { %9 = vsyncpa [#allocation4], 0  ;;  %s695_s12 = smov [#allocation2]   ;;  %s647_s16 = scalar_lea.hbm %s1137_s0, 256 }
   0x2   :  { %s15_s13 = sshll.u32 %s695_s12, 4  ;;  %p648_p0 = scmp.ne.s32.totalorder %s1137_s0, %s647_s16  ;;  %s16_s13 = int_to_ptr.vmem [resolvable:$true] %s15_s13 }
   0x3   :  { %p651_p1 = scmp.lt.u32.totalorder %s647_s16, %s1137_s0 }
   0x5   :  { %p653_p2 = pnand %p651_p1, %p648_p0 }
   0x7   :  { %656 = shalt.err (!%p653_p2)
}
   0x8   :  { %s657_s21 = scalar_lea.vmem %s16_s13, 256  ;;  %p662_p4 = scmp.lt.s32.totalorder %s16_s13, %s16_s13 }
   0x9   :  { %p658_p3 = scmp.ne.s32.totalorder %s16_s13, %s657_s21  ;;  %p663_p5 = scmp.lt.s32.totalorder %s657_s21, %s657_s21 }
   0xb   :  { %p664_p6 = por %p663_p5, %p662_p4 }
   0xd   :  { %p665_p7 = pnand %p664_p6, %p658_p3 }
   0xf   :  { %668 = shalt.err (!%p665_p7)
}
  0x10   :  { %s696_s22 = smov 128   ;;  %s697_s23 = smov 8  }
  0x11   :  { %21 = dma.hbm_to_vmem [thread:$0]  %s1137_s0, 256, %s16_s13, [#allocation3], %s696_s22, %s696_s22, %s697_s23  }
  0x12   :  { %691 = dma.done.wait [#allocation3], 256  }
  0x13   :  { %692 = vsyncadd [#allocation3], 4294967040  ;;  %v698_v0 = vmov 7   ;;  %v699_v1 = vmov 4   ;;  %v31_v2 = vld [vmem:[%s1138_s1] sm:$0xff]  ;;  %s700_s28 = smov 1   ;;  %v47_v13 = vlaneseq }
  0x14   :  { %637 = vset.pattern.permute.xlu0 %v698_v0  ;;  %639 = vset.pattern.permute.xlu1 %v699_v1  ;;  %v29_v3 = vld [vmem:[#allocation2] sm:$0xff]  ;;  %v701_v4 = vmov 6   ;;  %v702_v5 = vmov 3   ;;  %v703_v6 = vmov 1   ;;  %v704_v7 = vmov 0   ;;  %s709_s29 = smov 126  }
  0x15   :  { %93 = vperm.xlu0 %637, %v31_v2   ;;  %35 = vrot.lane.b32.xlu1 %v29_v3, %s700_s28  ;;  %v705_v8 = vmov 8   ;;  %v30_v9 = vld [vmem:[#allocation2 + $0x8] sm:$0x3]  ;;  %v32_v10 = vld [vmem:[%s1139_s2] sm:$0xff]  ;;  %v706_v11 = vmov 5   ;;  %v707_v12 = vmov 2  }
  0x16   :  { %vm41_vm0 = vcmask 7168   ;;  %v48_v15 = vshrl.u32 %v47_v13, 7  ;;  %vm44_vm1 = vcmask 89088   ;;  %s708_s2 = smov 127   ;;  %s710_s30 = smov 11   ;;  %vm576_vm2 = vcmask 179200  }
  0x17   :  { %s711_s4 = smov 22   ;;  %s712_s5 = smov 33   ;;  %vm578_vm3 = vcmask 269312   ;;  %vm580_vm4 = vcmask 359424   ;;  %vm582_vm5 = vcmask 449536   ;;  %vm584_vm6 = vcmask 539648  }
  0x18   :  { %v49_v17 = vsub.s32 0, %v48_v15  ;;  %v53_v19 = vsub.s32 1, %v48_v15  ;;  %v57_v22 = vsub.s32 2, %v48_v15  ;;  %v61_v26 = vsub.s32 3, %v48_v15  ;;  %s713_s6 = smov 44   ;;  %s714_s7 = smov 55  }
  0x19   :  { %638 = vset.pattern.permute.xlu0 %v701_v4  ;;  %105 = vperm.xlu1 %639, %v31_v2   ;;  %v65_v32 = vsub.s32 4, %v48_v15  ;;  %v69_v37 = vsub.s32 5, %v48_v15  ;;  %v73_v42 = vsub.s32 6, %v48_v15  ;;  %v77_v45 = vsub.s32 7, %v48_v15  ;;  %s715_s8 = smov 66   ;;  %s716_s9 = smov 77  }
  0x1a   :  { %97 = vperm.xlu0 %638, %v31_v2   ;;  %s717_s10 = smov 88   ;;  %s718_s11 = smov 99   ;;  %vm586_vm7 = vcmask 629760   ;;  %vm588_vm8 = vcmask 719872   ;;  %vm590_vm9 = vcmask 809984   ;;  %vm592_vm10 = vcmask 900096  }
  0x1b   :  { %s719_s12 = smov 110   ;;  %s720_s13 = smov [#allocation5]   ;;  %vm594_vm11 = vcmask 990208  }
  0x1c   :  { %s602_s14 = sshll.u32 %s720_s13, 4  ;;  %s603_s14 = int_to_ptr.vmem [resolvable:$true] %s602_s14 }
  0x1d   :  { %640 = vset.pattern.permute.xlu1 %v702_v5  ;;  %s669_s15 = scalar_lea.vmem %s603_s14, 128  ;;  %p674_p9 = scmp.lt.s32.totalorder %s603_s14, %s603_s14 }
  0x1e   :  { %641 = vset.pattern.permute.xlu0 %v703_v6  ;;  %109 = vperm.xlu1 %640, %v31_v2   ;;  %p670_p8 = scmp.ne.s32.totalorder %s603_s14, %s669_s15  ;;  %p675_p10 = scmp.lt.s32.totalorder %s669_s15, %s669_s15 }
  0x1f   :  { %117 = vperm.xlu0 %641, %v31_v2  }
  0x20   :  { %p676_p11 = por %p675_p10, %p674_p9 }
  0x22   :  { %642 = vset.pattern.permute.xlu1 %v704_v7  ;;  %p677_p12 = pnand %p676_p11, %p670_p8 }
  0x23   :  { %643 = vset.pattern.permute.xlu0 %v705_v8  ;;  %121 = vperm.xlu1 %642, %v31_v2  }
  0x24   :  { %89 = vperm.xlu0 %643, %v31_v2  }
  0x27   :  { %37 = vrot.lane.b32.xlu1 %v30_v9, %s700_s28 }
  0x28   :  { %646 = vset.pattern.permute.xlu0 %v704_v7 }
  0x2b   :  { %126 = vperm.xlu1 %642, %v32_v10  }
  0x2f   :  { %644 = vset.pattern.permute.xlu1 %v706_v11 }
  0x30   :  { %101 = vperm.xlu1 %644, %v31_v2  }
  0x34   :  { %645 = vset.pattern.permute.xlu1 %v707_v12 }
  0x35   :  { %113 = vperm.xlu1 %645, %v31_v2  }
  0x87   :  { %v36_v14 = vpop.permute.xlu1 %35 }
  0x88   :  { %v42_v16 = vsel %vm41_vm0, 0.0, %v36_v14 }
  0x89   :  { %v45_v18 = vsel %vm44_vm1, %v42_v16, 0.0 }
  0x8a   :  { %v761_v20 = vrot.slane %v45_v18, %v49_v17  ;;  %v765_v23 = vrot.slane %v45_v18, %v53_v19  ;;  %v772_v27 = vrot.slane %v45_v18, %v57_v22  ;;  %v786_v33 = vrot.slane %v45_v18, %v61_v26 }
  0x8b   :  { %v796_v38 = vrot.slane %v45_v18, %v65_v32  ;;  %v812_v46 = vrot.slane %v45_v18, %v69_v37  ;;  %v816_v48 = vrot.slane %v45_v18, %v73_v42  ;;  %v826_v54 = vrot.slane %v45_v18, %v77_v45 }
  0x94   :  { %v763_v21 = vpop.permute.xlu0 %93 }
  0x95   :  { %v159_v24 = vmul.f32 %v763_v21, %v761_v20  ;;  %v201_v29 = vmul.f32 %v763_v21, %v765_v23  ;;  %v243_v35 = vmul.f32 %v763_v21, %v772_v27  ;;  %v285_v40 = vmul.f32 %v763_v21, %v786_v33 }
  0x96   :  { %v327_v47 = vmul.f32 %v763_v21, %v796_v38  ;;  %v369_v57 = vmul.f32 %v763_v21, %v812_v46  ;;  %v411_v61 = vmul.f32 %v763_v21, %v816_v48 }
  0x97   :  { %161 = vrot.lane.b32.xlu0 %v159_v24, %s708_s2 }
  0x98   :  { %v770_v25 = vpop.permute.xlu1 %105 }
  0x99   :  { %v774_v28 = vpop.permute.xlu0 %97  ;;  %v784_v31 = vmul.f32 %v770_v25, %v761_v20  ;;  %v173_v59 = vmul.f32 %v770_v25, %v765_v23  ;;  %v215_v11 = vmul.f32 %v770_v25, %v772_v27 }
  0x9a   :  { %v165_v30 = vmul.f32 %v774_v28, %v761_v20  ;;  %v207_v36 = vmul.f32 %v774_v28, %v765_v23  ;;  %v249_v44 = vmul.f32 %v774_v28, %v772_v27  ;;  %v291_v50 = vmul.f32 %v774_v28, %v786_v33 }
  0x9b   :  { %203 = vrot.lane.b32.xlu0 %v201_v29, %s708_s2  ;;  %v333_v60 = vmul.f32 %v774_v28, %v796_v38  ;;  %v375_v22 = vmul.f32 %v774_v28, %v812_v46 }
  0x9c   :  { %167 = vrot.lane.b32.xlu1 %v165_v30, %s709_s29 }
  0x9d   :  { %v788_v34 = vpop.permute.xlu1 %109 }
  0x9e   :  { %v798_v39 = vpop.permute.xlu0 %117  ;;  %v804_v41 = vmul.f32 %v788_v34, %v761_v20 }
  0x9f   :  { %245 = vrot.lane.b32.xlu0 %v243_v35, %s708_s2 }
  0xa0   :  { %209 = vrot.lane.b32.xlu1 %v207_v36, %s709_s29 }
  0xa2   :  { %v806_v43 = vpop.permute.xlu1 %121 }
  0xa3   :  { %287 = vrot.lane.b32.xlu0 %v285_v40, %s708_s2  ;;  %v820_v51 = vpop.permute.xlu0 %89 }
  0xa4   :  { %251 = vrot.lane.b32.xlu1 %v249_v44, %s709_s29  ;;  %v199_v62 = vmul.f32 %v820_v51, %v765_v23  ;;  %v241_v1 = vmul.f32 %v820_v51, %v772_v27  ;;  %v283_v2 = vmul.f32 %v820_v51, %v786_v33  ;;  %v325_v4 = vmul.f32 %v820_v51, %v796_v38 }
  0xa5   :  { %v367_v5 = vmul.f32 %v820_v51, %v812_v46  ;;  %v409_v6 = vmul.f32 %v820_v51, %v816_v48  ;;  %v451_v10 = vmul.f32 %v820_v51, %v826_v54 }
  0xa6   :  { %v38_v49 = vpop.permute.xlu1 %37 }
  0xa7   :  { %v43_v52 = vsel %vm41_vm0, 0.0, %v38_v49  ;;  %329 = vrot.lane.b32.xlu0 %v327_v47, %s708_s2 }
  0xa8   :  { %v46_v53 = vsel %vm44_vm1, %v43_v52, 0.0  ;;  %293 = vrot.lane.b32.xlu1 %v291_v50, %s709_s29  ;;  %v453_v50 = vmul.f32 %v763_v21, %v826_v54  ;;  %v179_v52 = vmul.f32 %v788_v34, %v765_v23 }
  0xa9   :  { %v828_v55 = vrot.slane %v46_v53, %v49_v17  ;;  %v830_v56 = vrot.slane %v46_v53, %v53_v19  ;;  %v257_v53 = vmul.f32 %v770_v25, %v786_v33 }
  0xaa   :  { %v834_v58 = vpop.permute.xlu1 %126 }
  0xab   :  { %371 = vrot.lane.b32.xlu0 %v369_v57, %s708_s2  ;;  %v847_v63 = vmul.f32 %v763_v21, %v828_v55  ;;  %v851_v0 = vmul.f32 %v774_v28, %v828_v55  ;;  %v860_v3 = vmul.f32 %v770_v25, %v830_v56  ;;  %v870_v7 = vmul.f32 %v763_v21, %v830_v56 }
  0xac   :  { %175 = vrot.lane.b32.xlu1 %v173_v59, %s708_s2  ;;  %v874_v8 = vmul.f32 %v788_v34, %v830_v56  ;;  %v878_v9 = vmul.f32 %v774_v28, %v830_v56  ;;  %v885_v12 = vadd.f32 %v199_v62, %v834_v58  ;;  %v888_v13 = vadd.f32 %v241_v1, %v834_v58 }
  0xad   :  { %v891_v14 = vadd.f32 %v283_v2, %v834_v58  ;;  %v897_v16 = vadd.f32 %v325_v4, %v834_v58  ;;  %v900_v17 = vadd.f32 %v367_v5, %v834_v58  ;;  %v903_v18 = vadd.f32 %v409_v6, %v834_v58 }
  0xae   :  { %v906_v19 = vadd.f32 %v451_v10, %v834_v58  ;;  %v493_v37 = vmul.f32 %v820_v51, %v828_v55  ;;  %v521_v42 = vmul.f32 %v820_v51, %v830_v56  ;;  %v417_v57 = vmul.f32 %v774_v28, %v816_v48 }
  0xaf   :  { %335 = vrot.lane.b32.xlu0 %v333_v60, %s709_s29  ;;  %v894_v15 = vpop.permute.xlu1 %101  ;;  %v221_v21 = vmul.f32 %v788_v34, %v772_v27  ;;  %v299_v59 = vmul.f32 %v770_v25, %v796_v38  ;;  %v459_v60 = vmul.f32 %v774_v28, %v826_v54  ;;  %v341_v62 = vmul.f32 %v770_v25, %v812_v46 }
  0xb0   :  { %413 = vrot.lane.b32.xlu1 %v411_v61, %s708_s2  ;;  %v913_v24 = vmul.f32 %v894_v15, %v772_v27  ;;  %v917_v26 = vmul.f32 %v894_v15, %v786_v33  ;;  %v921_v29 = vmul.f32 %v894_v15, %v796_v38  ;;  %v925_v30 = vmul.f32 %v894_v15, %v812_v46 }
  0xb1   :  { %v929_v32 = vmul.f32 %v894_v15, %v816_v48  ;;  %v933_v35 = vmul.f32 %v894_v15, %v826_v54  ;;  %v937_v36 = vmul.f32 %v894_v15, %v828_v55  ;;  %v943_v40 = vmul.f32 %v894_v15, %v830_v56 }
  0xb2   :  { %v129_v44 = vmul.f32 %v894_v15, %v761_v20  ;;  %v952_v45 = vadd.f32 %v493_v37, %v834_v58  ;;  %v955_v47 = vadd.f32 %v521_v42, %v834_v58  ;;  %v263_v61 = vmul.f32 %v788_v34, %v786_v33 }
  0xb3   :  { %217 = vrot.lane.b32.xlu0 %v215_v11, %s708_s2  ;;  %v305_v1 = vmul.f32 %v788_v34, %v796_v38  ;;  %v383_v28 = vmul.f32 %v770_v25, %v816_v48  ;;  %v187_v2 = vmul.f32 %v798_v39, %v772_v27  ;;  %v347_v4 = vmul.f32 %v788_v34, %v812_v46 }
  0xb4   :  { %377 = vrot.lane.b32.xlu1 %v375_v22, %s709_s29  ;;  %v958_v49 = vadd.f32 %v129_v44, %v834_v58  ;;  %v425_v5 = vmul.f32 %v770_v25, %v826_v54  ;;  %v229_v6 = vmul.f32 %v798_v39, %v786_v33  ;;  %v389_v10 = vmul.f32 %v788_v34, %v816_v48 }
  0xb5   :  { %v467_v11 = vmul.f32 %v770_v25, %v828_v55  ;;  %v193_v22 = vmul.f32 %v806_v43, %v772_v27  ;;  %v271_v37 = vmul.f32 %v798_v39, %v796_v38  ;;  %v431_v42 = vmul.f32 %v788_v34, %v826_v54 }
  0xb6   :  { %v235_v25 = vmul.f32 %v806_v43, %v786_v33  ;;  %v313_v44 = vmul.f32 %v798_v39, %v812_v46 }
  0xb7   :  { %455 = vrot.lane.b32.xlu0 %v453_v50, %s708_s2  ;;  %v473_v50 = vmul.f32 %v788_v34, %v828_v55  ;;  %v397_v34 = vmul.f32 %v798_v39, %v826_v54 }
  0xb8   :  { %181 = vrot.lane.b32.xlu1 %v179_v52, %s709_s29  ;;  %v277_v52 = vmul.f32 %v806_v43, %v796_v38 }
  0xbb   :  { %259 = vrot.lane.b32.xlu0 %v257_v53, %s708_s2  ;;  %v355_v53 = vmul.f32 %v798_v39, %v816_v48 }
  0xbc   :  { %419 = vrot.lane.b32.xlu1 %v417_v57, %s709_s29  ;;  %v361_v57 = vmul.f32 %v806_v43, %v816_v48 }
  0xbf   :  { %223 = vrot.lane.b32.xlu0 %v221_v21, %s709_s29  ;;  %v439_v21 = vmul.f32 %v798_v39, %v828_v55 }
  0xc0   :  { %301 = vrot.lane.b32.xlu1 %v299_v59, %s708_s2  ;;  %v403_v59 = vmul.f32 %v806_v43, %v826_v54 }
  0xc3   :  { %461 = vrot.lane.b32.xlu0 %v459_v60, %s709_s29  ;;  %v445_v60 = vmul.f32 %v806_v43, %v828_v55 }
  0xc4   :  { %265 = vrot.lane.b32.xlu1 %v263_v61, %s709_s29  ;;  %v487_v61 = vmul.f32 %v806_v43, %v830_v56 }
  0xc7   :  { %343 = vrot.lane.b32.xlu0 %v341_v62, %s708_s2  ;;  %v145_v62 = vmul.f32 %v798_v39, %v765_v23 }
  0xc8   :  { %307 = vrot.lane.b32.xlu1 %v305_v1, %s709_s29  ;;  %v1082_v1 = vpop.permute.xlu1 %113 }
  0xcb   :  { %385 = vrot.lane.b32.xlu0 %v383_v28, %s708_s2 }
  0xcc   :  { %189 = vrot.lane.b32.xlu1 %v187_v2, %s708_s2 }
  0xcf   :  { %349 = vrot.lane.b32.xlu0 %v347_v4, %s709_s29 }
  0xd0   :  { %427 = vrot.lane.b32.xlu1 %v425_v5, %s708_s2 }
  0xd3   :  { %231 = vrot.lane.b32.xlu0 %v229_v6, %s708_s2 }
  0xd4   :  { %391 = vrot.lane.b32.xlu1 %v389_v10, %s709_s29 }
  0xd7   :  { %469 = vrot.lane.b32.xlu0 %v467_v11, %s708_s2 }
  0xd8   :  { %195 = vrot.lane.b32.xlu1 %v193_v22, %s709_s29 }
  0xdb   :  { %273 = vrot.lane.b32.xlu0 %v271_v37, %s708_s2 }
  0xdc   :  { %433 = vrot.lane.b32.xlu1 %v431_v42, %s709_s29 }
  0xdf   :  { %497 = vrot.lane.b32.xlu0 %v847_v63, %s708_s2  ;;  %v319_v63 = vmul.f32 %v806_v43, %v812_v46 }
  0xe0   :  { %237 = vrot.lane.b32.xlu1 %v235_v25, %s709_s29 }
  0xe3   :  { %315 = vrot.lane.b32.xlu0 %v313_v44, %s708_s2 }
  0xe4   :  { %475 = vrot.lane.b32.xlu1 %v473_v50, %s709_s29 }
  0xe7   :  { %279 = vrot.lane.b32.xlu0 %v277_v52, %s709_s29 }
  0xe8   :  { %357 = vrot.lane.b32.xlu1 %v355_v53, %s708_s2 }
  0xeb   :  { %503 = vrot.lane.b32.xlu0 %v851_v0, %s709_s29  ;;  %v481_v0 = vmul.f32 %v798_v39, %v830_v56 }
  0xec   :  { %321 = vrot.lane.b32.xlu1 %v319_v63, %s709_s29 }
  0xef   :  { %399 = vrot.lane.b32.xlu0 %v397_v34, %s708_s2 }
  0xf0   :  { %363 = vrot.lane.b32.xlu1 %v361_v57, %s709_s29 }
  0xf3   :  { %441 = vrot.lane.b32.xlu0 %v439_v21, %s708_s2 }
  0xf4   :  { %405 = vrot.lane.b32.xlu1 %v403_v59, %s709_s29 }
  0xf7   :  { %483 = vrot.lane.b32.xlu0 %v481_v0, %s708_s2 }
  0xf8   :  { %447 = vrot.lane.b32.xlu1 %v445_v60, %s709_s29 }
  0xfb   :  { %511 = vrot.lane.b32.xlu0 %v860_v3, %s708_s2 }
  0xfc   :  { %489 = vrot.lane.b32.xlu1 %v487_v61, %s709_s29 }
  0xff   :  { %525 = vrot.lane.b32.xlu0 %v870_v7, %s708_s2  ;;  %v157_v7 = vmul.f32 %v820_v51, %v761_v20 }
 0x100   :  { %517 = vrot.lane.b32.xlu1 %v874_v8, %s709_s29  ;;  %v151_v8 = vmul.f32 %v806_v43, %v765_v23 }
 0x103   :  { %531 = vrot.lane.b32.xlu0 %v878_v9, %s709_s29  ;;  %v158_v9 = vadd.f32 %v157_v7, %v834_v58 }
 0x104   :  { %133 = vrot.lane.b32.xlu1 %v784_v31, %s708_s2 }
 0x107   :  { %139 = vrot.lane.b32.xlu0 %v804_v41, %s709_s29  ;;  %v171_v41 = vmul.f32 %v894_v15, %v765_v23 }
 0x108   :  { %147 = vrot.lane.b32.xlu1 %v145_v62, %s708_s2 }
 0x109   :  { %v162_v3 = vpop.permute.xlu0 %161 }
 0x10a   :  { %v164_v31 = vadd.f32 %v162_v3, %v158_v9 }
 0x10b   :  { %153 = vrot.lane.b32.xlu0 %v151_v8, %s709_s29 }
 0x10d   :  { %v204_v39 = vpop.permute.xlu0 %203 }
 0x10e   :  { %v168_v28 = vpop.permute.xlu1 %167  ;;  %v206_v4 = vadd.f32 %v204_v39, %v885_v12 }
 0x10f   :  { %v170_v2 = vadd.f32 %v168_v28, %v164_v31 }
 0x111   :  { %v246_v5 = vpop.permute.xlu0 %245  ;;  %v172_v20 = vadd.f32 %v171_v41, %v170_v2 }
 0x112   :  { %v210_v51 = vpop.permute.xlu1 %209  ;;  %v248_v43 = vadd.f32 %v246_v5, %v888_v13 }
 0x113   :  { %v212_v6 = vadd.f32 %v210_v51, %v206_v4  ;;  %v269_v51 = vmul.f32 %v1082_v1, %v796_v38  ;;  %v353_v38 = vmul.f32 %v1082_v1, %v816_v48  ;;  %v437_v48 = vmul.f32 %v1082_v1, %v828_v55 }
 0x115   :  { %v288_v10 = vpop.permute.xlu0 %287  ;;  %v214_v58 = vadd.f32 %v913_v24, %v212_v6 }
 0x116   :  { %v252_v11 = vpop.permute.xlu1 %251  ;;  %v290_v37 = vadd.f32 %v288_v10, %v891_v14 }
 0x117   :  { %v254_v22 = vadd.f32 %v252_v11, %v248_v43 }
 0x119   :  { %v330_v42 = vpop.permute.xlu0 %329  ;;  %v256_v25 = vadd.f32 %v917_v26, %v254_v22 }
 0x11a   :  { %v294_v44 = vpop.permute.xlu1 %293  ;;  %v332_v53 = vadd.f32 %v330_v42, %v897_v16 }
 0x11b   :  { %v296_v15 = vadd.f32 %v294_v44, %v290_v37 }
 0x11d   :  { %v372_v50 = vpop.permute.xlu0 %371  ;;  %v298_v12 = vadd.f32 %v921_v29, %v296_v15  ;;  %v185_v29 = vmul.f32 %v1082_v1, %v772_v27 }
 0x11e   :  { %v176_v52 = vpop.permute.xlu1 %175  ;;  %v374_v57 = vadd.f32 %v372_v50, %v900_v17 }
 0x11f   :  { %v178_v0 = vadd.f32 %v176_v52, %v172_v20 }
 0x121   :  { %v336_v63 = vpop.permute.xlu0 %335 }
 0x122   :  { %v338_v13 = vadd.f32 %v336_v63, %v332_v53  ;;  %v414_v34 = vpop.permute.xlu1 %413  ;;  %v395_v63 = vmul.f32 %v1082_v1, %v826_v54 }
 0x123   :  { %v416_v16 = vadd.f32 %v414_v34, %v903_v18 }
 0x124   :  { %v340_v24 = vadd.f32 %v925_v30, %v338_v13 }
 0x125   :  { %v218_v21 = vpop.permute.xlu0 %217 }
 0x126   :  { %v378_v14 = vpop.permute.xlu1 %377  ;;  %v220_v9 = vadd.f32 %v218_v21, %v214_v58 }
 0x127   :  { %v380_v59 = vadd.f32 %v378_v14, %v374_v57 }
 0x129   :  { %v456_v26 = vpop.permute.xlu0 %455  ;;  %v382_v60 = vadd.f32 %v929_v32, %v380_v59  ;;  %v227_v32 = vmul.f32 %v1082_v1, %v786_v33  ;;  %v311_v33 = vmul.f32 %v1082_v1, %v812_v46 }
 0x12a   :  { %v182_v61 = vpop.permute.xlu1 %181  ;;  %v458_v2 = vadd.f32 %v456_v26, %v906_v19 }
 0x12b   :  { %v184_v62 = vadd.f32 %v182_v61, %v178_v0 }
 0x12d   :  { %v260_v3 = vpop.permute.xlu0 %259  ;;  %v186_v7 = vadd.f32 %v185_v29, %v184_v62 }
 0x12e   :  { %v420_v8 = vpop.permute.xlu1 %419  ;;  %v262_v4 = vadd.f32 %v260_v3, %v256_v25 }
 0x12f   :  { %v422_v30 = vadd.f32 %v420_v8, %v416_v16  ;;  %v479_v8 = vmul.f32 %v1082_v1, %v830_v56 }
 0x131   :  { %v224_v17 = vpop.permute.xlu0 %223  ;;  %v424_v31 = vadd.f32 %v933_v35, %v422_v30 }
 0x132   :  { %v226_v39 = vadd.f32 %v224_v17, %v220_v9  ;;  %v302_v28 = vpop.permute.xlu1 %301 }
 0x133   :  { %v304_v43 = vadd.f32 %v302_v28, %v298_v12 }
 0x134   :  { %v228_v41 = vadd.f32 %v227_v32, %v226_v39 }
 0x135   :  { %v462_v27 = vpop.permute.xlu0 %461 }
 0x136   :  { %v464_v5 = vadd.f32 %v462_v27, %v458_v2  ;;  %v266_v18 = vpop.permute.xlu1 %265 }
 0x137   :  { %v268_v20 = vadd.f32 %v266_v18, %v262_v4 }
 0x138   :  { %v466_v6 = vadd.f32 %v937_v36, %v464_v5 }
 0x139   :  { %v344_v35 = vpop.permute.xlu0 %343  ;;  %v270_v10 = vadd.f32 %v269_v51, %v268_v20 }
 0x13a   :  { %v308_v58 = vpop.permute.xlu1 %307  ;;  %v346_v42 = vadd.f32 %v344_v35, %v340_v24 }
 0x13b   :  { %v310_v11 = vadd.f32 %v308_v58, %v304_v43 }
 0x13d   :  { %v386_v19 = vpop.permute.xlu0 %385  ;;  %v312_v22 = vadd.f32 %v311_v33, %v310_v11 }
 0x13e   :  { %v190_v37 = vpop.permute.xlu1 %189  ;;  %v388_v36 = vadd.f32 %v386_v19, %v382_v60 }
 0x13f   :  { %v192_v13 = vadd.f32 %v190_v37, %v186_v7 }
 0x141   :  { %v350_v25 = vpop.permute.xlu0 %349 }
 0x142   :  { %v352_v44 = vadd.f32 %v350_v25, %v346_v42  ;;  %v428_v15 = vpop.permute.xlu1 %427 }
 0x143   :  { %v430_v24 = vadd.f32 %v428_v15, %v424_v31 }
 0x144   :  { %v354_v50 = vadd.f32 %v353_v38, %v352_v44 }
 0x145   :  { %v232_v12 = vpop.permute.xlu0 %231 }
 0x146   :  { %v392_v52 = vpop.permute.xlu1 %391  ;;  %v234_v26 = vadd.f32 %v232_v12, %v228_v41 }
 0x147   :  { %v394_v53 = vadd.f32 %v392_v52, %v388_v36 }
 0x149   :  { %v470_v46 = vpop.permute.xlu0 %469  ;;  %v396_v34 = vadd.f32 %v395_v63, %v394_v53  ;;  %v143_v63 = vmul.f32 %v1082_v1, %v765_v23 }
 0x14a   :  { %v196_v57 = vpop.permute.xlu1 %195  ;;  %v472_v54 = vadd.f32 %v470_v46, %v466_v6 }
 0x14b   :  { %v198_v21 = vadd.f32 %v196_v57, %v192_v13 }
 0x14d   :  { %v274_v14 = vpop.permute.xlu0 %273  ;;  %536 = vrot.lane.b32.xlu1 %v198_v21, %s710_s30 }
 0x14e   :  { %v434_v59 = vpop.permute.xlu1 %433  ;;  %v276_v30 = vadd.f32 %v274_v14, %v270_v10 }
 0x14f   :  { %v436_v0 = vadd.f32 %v434_v59, %v430_v24 }
 0x151   :  { %v498_v60 = vpop.permute.xlu0 %497  ;;  %v438_v61 = vadd.f32 %v437_v48, %v436_v0 }
 0x152   :  { %v238_v62 = vpop.permute.xlu1 %237  ;;  %v500_v55 = vadd.f32 %v498_v60, %v952_v45 }
 0x153   :  { %v240_v29 = vadd.f32 %v238_v62, %v234_v26 }
 0x155   :  { %v316_v16 = vpop.permute.xlu0 %315  ;;  %540 = vrot.lane.b32.xlu0 %v240_v29, %s711_s4 }
 0x156   :  { %v476_v3 = vpop.permute.xlu1 %475  ;;  %v318_v28 = vadd.f32 %v316_v16, %v312_v22 }
 0x157   :  { %v478_v7 = vadd.f32 %v476_v3, %v472_v54 }
 0x159   :  { %v280_v9 = vpop.permute.xlu0 %279  ;;  %v480_v17 = vadd.f32 %v479_v8, %v478_v7 }
 0x15a   :  { %v282_v31 = vadd.f32 %v280_v9, %v276_v30  ;;  %v358_v39 = vpop.permute.xlu1 %357 }
 0x15b   :  { %v360_v5 = vadd.f32 %v358_v39, %v354_v50 }
 0x15c   :  { %544 = vrot.lane.b32.xlu1 %v282_v31, %s712_s5 }
 0x15d   :  { %v504_v32 = vpop.permute.xlu0 %503 }
 0x15e   :  { %v506_v2 = vadd.f32 %v504_v32, %v500_v55  ;;  %v322_v41 = vpop.permute.xlu1 %321 }
 0x15f   :  { %v324_v4 = vadd.f32 %v322_v41, %v318_v28 }
 0x160   :  { %v508_v27 = vadd.f32 %v943_v40, %v506_v2 }
 0x161   :  { %v400_v18 = vpop.permute.xlu0 %399  ;;  %548 = vrot.lane.b32.xlu0 %v324_v4, %s713_s6 }
 0x162   :  { %v364_v56 = vpop.permute.xlu1 %363  ;;  %v402_v51 = vadd.f32 %v400_v18, %v396_v34 }
 0x163   :  { %v366_v20 = vadd.f32 %v364_v56, %v360_v5 }
 0x165   :  { %v442_v6 = vpop.permute.xlu0 %441  ;;  %552 = vrot.lane.b32.xlu1 %v366_v20, %s714_s7 }
 0x166   :  { %v406_v45 = vpop.permute.xlu1 %405  ;;  %v444_v35 = vadd.f32 %v442_v6, %v438_v61 }
 0x167   :  { %v408_v43 = vadd.f32 %v406_v45, %v402_v51 }
 0x169   :  { %v484_v10 = vpop.permute.xlu0 %483  ;;  %556 = vrot.lane.b32.xlu0 %v408_v43, %s715_s8 }
 0x16a   :  { %v448_v58 = vpop.permute.xlu1 %447  ;;  %v486_v33 = vadd.f32 %v484_v10, %v480_v17 }
 0x16b   :  { %v450_v11 = vadd.f32 %v448_v58, %v444_v35 }
 0x16d   :  { %v512_v40 = vpop.permute.xlu0 %511  ;;  %560 = vrot.lane.b32.xlu1 %v450_v11, %s716_s9 }
 0x16e   :  { %v490_v19 = vpop.permute.xlu1 %489  ;;  %v514_v37 = vadd.f32 %v512_v40, %v508_v27 }
 0x16f   :  { %v492_v22 = vadd.f32 %v490_v19, %v486_v33 }
 0x171   :  { %v526_v42 = vpop.permute.xlu0 %525  ;;  %564 = vrot.lane.b32.xlu0 %v492_v22, %s717_s10 }
 0x172   :  { %v518_v25 = vpop.permute.xlu1 %517  ;;  %v528_v15 = vadd.f32 %v526_v42, %v955_v47 }
 0x173   :  { %v520_v44 = vadd.f32 %v518_v25, %v514_v37 }
 0x175   :  { %v532_v38 = vpop.permute.xlu0 %531  ;;  %568 = vrot.lane.b32.xlu1 %v520_v44, %s718_s11 }
 0x176   :  { %v534_v50 = vadd.f32 %v532_v38, %v528_v15  ;;  %v134_v36 = vpop.permute.xlu1 %133 }
 0x177   :  { %v136_v12 = vadd.f32 %v134_v36, %v958_v49 }
 0x178   :  { %572 = vrot.lane.b32.xlu0 %v534_v50, %s719_s12 }
 0x179   :  { %v140_v52 = vpop.permute.xlu0 %139 }
 0x17a   :  { %v142_v53 = vadd.f32 %v140_v52, %v136_v12  ;;  %v148_v46 = vpop.permute.xlu1 %147 }
 0x17c   :  { %v144_v13 = vadd.f32 %v143_v63, %v142_v53 }
 0x17d   :  { %v154_v34 = vpop.permute.xlu0 %153 }
 0x17e   :  { %v150_v24 = vadd.f32 %v148_v46, %v144_v13 }
 0x180   :  { %v156_v0 = vadd.f32 %v154_v34, %v150_v24 }
 0x1bf   :  { %v537_v57 = vpop.permute.xlu1 %536 }
 0x1c0   :  { %v575_v49 = vsel %vm44_vm1, %v156_v0, %v537_v57 }
 0x1c7   :  { %v541_v21 = vpop.permute.xlu0 %540 }
 0x1c8   :  { %v577_v26 = vsel %vm576_vm2, %v575_v49, %v541_v21 }
 0x1ce   :  { %v545_v47 = vpop.permute.xlu1 %544 }
 0x1cf   :  { %v579_v23 = vsel %vm578_vm3, %v577_v26, %v545_v47 }
 0x1d3   :  { %v549_v14 = vpop.permute.xlu0 %548 }
 0x1d4   :  { %v581_v1 = vsel %vm580_vm4, %v579_v23, %v549_v14 }
 0x1d7   :  { %v553_v59 = vpop.permute.xlu1 %552 }
 0x1d8   :  { %v583_v61 = vsel %vm582_vm5, %v581_v1, %v553_v59 }
 0x1db   :  { %v557_v48 = vpop.permute.xlu0 %556 }
 0x1dc   :  { %v585_v29 = vsel %vm584_vm6, %v583_v61, %v557_v48 }
 0x1df   :  { %v561_v60 = vpop.permute.xlu1 %560 }
 0x1e0   :  { %v587_v16 = vsel %vm586_vm7, %v585_v29, %v561_v60 }
 0x1e3   :  { %v565_v62 = vpop.permute.xlu0 %564 }
 0x1e4   :  { %v589_v3 = vsel %vm588_vm8, %v587_v16, %v565_v62 }
 0x1e7   :  { %v569_v54 = vpop.permute.xlu1 %568 }
 0x1e8   :  { %v591_v7 = vsel %vm590_vm9, %v589_v3, %v569_v54 }
 0x1ea   :  { %v573_v8 = vpop.permute.xlu0 %572 }
 0x1eb   :  { %v593_v30 = vsel %vm592_vm10, %v591_v7, %v573_v8 }
 0x1ec   :  { %595 = vst.msk [vmem:[#allocation5] sm:$0xff] %vm594_vm11, %v593_v30 }
 0x1ed   :  { %680 = shalt.err (!%p677_p12)
}
 0x1ee   :  { %s681_s18 = scalar_lea.hbm %s1140_s3, 128 }
 0x1ef   :  { %p682_p13 = scmp.ne.s32.totalorder %s1140_s3, %s681_s18  ;;  %p685_p0 = scmp.lt.u32.totalorder %s681_s18, %s1140_s3 }
 0x1f1   :  { %p687_p1 = pnand %p685_p0, %p682_p13 }
 0x1f3   :  { %690 = shalt.err (!%p687_p1)
}
 0x1f4   :  { %605 = dma.vmem_to_hbm [thread:$0]  %s603_s14, 128, %s1140_s3, [#allocation4]  }
 0x1f5   :  { %693 = dma.done.wait [#allocation4], 128  }
 0x1f6   :  { %694 = vsyncadd [#allocation4], 4294967168 }
 0x1f7   :  { %609 = vsyncpa [#allocation3], 1 }
 0x1f8   :  { %610 = vsyncpa [#allocation4], 1 }

</bundles_post_ra>
